<compile_context>
chip_gen: v6e
topology: v6e:2x2x1
jax: 0.10.0
libtpu: 0.0.40
codegen_flags: <defaults>
</compile_context>

<pallas_src>
import functools

import jax
import jax.numpy as jnp
from jax import lax
from jax.experimental import pallas as pl
from jax.experimental.pallas import tpu as pltpu

IN_DIM = 8
HIDDEN = 32
OUT_DIM = 1

# dot_general contracting the last dim of both operands: A (M,K) . B (N,K) -> (M,N)
_TRANS_B_DIMS = (((1,), (1,)), ((), ()))


def mlp_kernel(x_ref, w1_ref, b1_ref, w2_ref, b2_ref, o_ref):
    """One batch tile of Linear(8,32) -> ReLU -> Linear(32,1).

    x_ref : (TB, 8)    VMEM  streamed batch tile (rows on sublanes, features on lanes)
    w1_ref: (32, 8)    VMEM  first-layer weight, torch (out, in) layout (resident)
    b1_ref: (32, 1)    VMEM  first-layer bias as a column (lane-broadcast)
    w2_ref: (32, 1)    VMEM  second-layer weight as a column
    b2_ref: (1,)       SMEM  second-layer bias (scalar)
    o_ref : (1, 1, TB) VMEM  lane-dense output tile (batch mapped to lanes)
    """
    x = x_ref[...]                                           # (TB, 8)

    # Layer 1 on the MXU in transposed form: hT[j, b] = sum_f w1[j, f] * x[b, f]
    h = lax.dot_general(w1_ref[...], x, _TRANS_B_DIMS,
                        preferred_element_type=jnp.float32)  # (32, TB)
    h = jnp.maximum(h + b1_ref[...], 0.0)                    # bias + ReLU (VPU)

    # Layer 2 (K=32, N=1): VPU multiply + sublane reduction (XLU), not the MXU.
    out = jnp.sum(h * w2_ref[...], axis=0, keepdims=True)    # (1, TB)
    out = out + b2_ref[0]

    o_ref[...] = out[None].astype(o_ref.dtype)               # (1, 1, TB), lane-dense store


def _round_up(n, m):
    return ((n + m - 1) // m) * m


@functools.partial(jax.jit, static_argnames=("block_rows",))
def net_forward(x, w1, b1, w2, b2, *, block_rows=1024):
    """x: (B, 8) f32. torch-layout params: w1 (32,8), b1 (32,), w2 (1,32), b2 (1,).
    Returns (B, 1) f32, equal to relu(x @ w1.T + b1) @ w2.T + b2."""
    B = x.shape[0]
    # Batch tile: multiple of 128 so output tiles are lane-dense; cap at block_rows.
    tb = min(block_rows, _round_up(B, 128))
    b_pad = _round_up(B, tb)
    nt = b_pad // tb
    if b_pad != B:
        x = jnp.pad(x, ((0, b_pad - B), (0, 0)))  # padded rows are sliced off below

    # Tiny layout plumbing on the (VMEM-resident) params.
    w1_f = w1.astype(jnp.float32)                       # (32, 8)
    b1_col = b1.reshape(HIDDEN, 1).astype(jnp.float32)  # (32, 1)
    w2_col = w2.reshape(HIDDEN, 1).astype(jnp.float32)  # (1, 32) -> (32, 1)
    b2_s = b2.reshape(1).astype(jnp.float32)            # (1,) scalar in SMEM

    flops = 2 * b_pad * (IN_DIM * HIDDEN + HIDDEN)
    bytes_accessed = 4 * (b_pad * (IN_DIM + OUT_DIM)
                          + w1.size + b1.size + w2.size + b2.size)

    out = pl.pallas_call(
        mlp_kernel,
        out_shape=jax.ShapeDtypeStruct((nt, 1, tb), jnp.float32),
        grid=(nt,),
        in_specs=[
            pl.BlockSpec((tb, IN_DIM), lambda i: (i, 0)),       # streamed batch tile
            pl.BlockSpec((HIDDEN, IN_DIM), lambda i: (0, 0)),   # resident weights/biases
            pl.BlockSpec((HIDDEN, 1), lambda i: (0, 0)),
            pl.BlockSpec((HIDDEN, 1), lambda i: (0, 0)),
            pl.BlockSpec(memory_space=pltpu.MemorySpace.SMEM),  # scalar b2
        ],
        out_specs=pl.BlockSpec((1, 1, tb), lambda i: (i, 0, 0)),
        compiler_params=pltpu.CompilerParams(
            dimension_semantics=("parallel",)),
        cost_estimate=pl.CostEstimate(
            flops=flops, transcendentals=0, bytes_accessed=bytes_accessed),
    )(x, w1_f, b1_col, w2_col, b2_s)

    # Free (contiguous, order-preserving) reshape back to (B, 1).
    return out.reshape(b_pad, OUT_DIM)[:B]


def init_params(key):
    """torch.nn.Linear-style init: uniform(-1/sqrt(fan_in), 1/sqrt(fan_in)),
    weights stored in torch (out_features, in_features) layout."""
    k1, k2, k3, k4 = jax.random.split(key, 4)
    bound1 = 1.0 / float(IN_DIM) ** 0.5
    bound2 = 1.0 / float(HIDDEN) ** 0.5
    w1 = jax.random.uniform(k1, (HIDDEN, IN_DIM), jnp.float32, -bound1, bound1)
    b1 = jax.random.uniform(k2, (HIDDEN,), jnp.float32, -bound1, bound1)
    w2 = jax.random.uniform(k3, (OUT_DIM, HIDDEN), jnp.float32, -bound2, bound2)
    b2 = jax.random.uniform(k4, (OUT_DIM,), jnp.float32, -bound2, bound2)
    return w1, b1, w2, b2


def reference_forward(x, w1, b1, w2, b2):
    h = jnp.maximum(x @ w1.T + b1, 0.0)
    return h @ w2.T + b2


if __name__ == "__main__":
    key = jax.random.PRNGKey(0)
    kx, kp = jax.random.split(key)
    w1, b1, w2, b2 = init_params(kp)

    # Small batch (single tile) and a multi-tile case exercising grid + padding.
    for batch, block_rows in ((8, 1024), (300, 128)):
        x = jax.random.normal(jax.random.fold_in(kx, batch), (batch, IN_DIM),
                              jnp.float32)
        out = jax.block_until_ready(
            net_forward(x, w1, b1, w2, b2, block_rows=block_rows))
        ref = reference_forward(x, w1, b1, w2, b2)
        assert out.shape == (batch, OUT_DIM)
        assert jnp.allclose(out, ref, atol=1e-5, rtol=1e-5), (batch, block_rows)

    print("KERNEL_OK")
</pallas_src>

<mosaic_0001>
module attributes {stable_mosaic.version = 11 : i64} {
  func.func @mlp_kernel(%arg0: i32, %arg1: memref<128x8xf32, #tpu.memory_space<vmem>>, %arg2: memref<32x8xf32, #tpu.memory_space<vmem>>, %arg3: memref<32x1xf32, #tpu.memory_space<vmem>>, %arg4: memref<32x1xf32, #tpu.memory_space<vmem>>, %arg5: memref<1xf32, #tpu.memory_space<smem>>, %arg6: memref<1x1x128xf32, #tpu.memory_space<vmem>>) attributes {dimension_semantics = [#tpu.dimension_semantics<parallel>], iteration_bounds = array<i64: 1>, scalar_prefetch = 0 : i64, scratch_operands = 0 : i64, tpu.core_type = #tpu.core_type<tc>, window_params = [{transform_indices = @transform_0, window_bounds = array<i64: 128, 8>}, {pipeline_mode = #tpu.pipeline_mode<synchronous>, transform_indices = @transform_1, window_bounds = array<i64: 32, 8>}, {pipeline_mode = #tpu.pipeline_mode<synchronous>, transform_indices = @transform_2, window_bounds = array<i64: 32, 1>}, {pipeline_mode = #tpu.pipeline_mode<synchronous>, transform_indices = @transform_3, window_bounds = array<i64: 32, 1>}, {transform_indices = @transform_4, window_bounds = array<i64: 1>}, {transform_indices = @transform_5, window_bounds = array<i64: 1, 1, 128>}]} {
    %c0 = arith.constant 0 : index
    %c0_0 = arith.constant 0 : index
    %0 = vector.load %arg1[%c0, %c0_0] : memref<128x8xf32, #tpu.memory_space<vmem>>, vector<128x8xf32>
    %c0_1 = arith.constant 0 : index
    %c0_2 = arith.constant 0 : index
    %1 = vector.load %arg2[%c0_1, %c0_2] : memref<32x8xf32, #tpu.memory_space<vmem>>, vector<32x8xf32>
    %cst = arith.constant dense<0.000000e+00> : vector<32x128xf32>
    %2 = tpu.matmul %1, %0, %cst {dimension_numbers = #tpu.dot_dimension_numbers<[1], [1], [0], [0], [0, 0, 1, 0], [], []>} : vector<32x8xf32>, vector<128x8xf32>, vector<32x128xf32> -> vector<32x128xf32>
    %c0_3 = arith.constant 0 : index
    %c0_4 = arith.constant 0 : index
    %3 = vector.load %arg3[%c0_3, %c0_4] : memref<32x1xf32, #tpu.memory_space<vmem>>, vector<32x1xf32>
    %4 = vector.broadcast %3 : vector<32x1xf32> to vector<32x128xf32>
    %5 = arith.addf %2, %4 : vector<32x128xf32>
    %cst_5 = arith.constant 0.000000e+00 : f32
    %6 = vector.broadcast %cst_5 : f32 to vector<32x128xf32>
    %7 = arith.maximumf %5, %6 : vector<32x128xf32>
    %c0_6 = arith.constant 0 : index
    %c0_7 = arith.constant 0 : index
    %8 = vector.load %arg4[%c0_6, %c0_7] : memref<32x1xf32, #tpu.memory_space<vmem>>, vector<32x1xf32>
    %9 = vector.broadcast %8 : vector<32x1xf32> to vector<32x128xf32>
    %10 = arith.mulf %7, %9 : vector<32x128xf32>
    %cst_8 = arith.constant dense<0.000000e+00> : vector<128xf32>
    %11 = vector.multi_reduction <add>, %10, %cst_8 [0] : vector<32x128xf32> to vector<128xf32>
    %12 = vector.shape_cast %11 : vector<128xf32> to vector<1x128xf32>
    %c0_9 = arith.constant 0 : index
    %13 = memref.load %arg5[%c0_9] : memref<1xf32, #tpu.memory_space<smem>>
    %14 = vector.broadcast %13 : f32 to vector<1x128xf32>
    %15 = arith.addf %12, %14 : vector<1x128xf32>
    %16 = vector.shape_cast %15 : vector<1x128xf32> to vector<1x1x128xf32>
    %c0_10 = arith.constant 0 : index
    %c0_11 = arith.constant 0 : index
    %c0_12 = arith.constant 0 : index
    %17 = vector.load %arg6[%c0_10, %c0_11, %c0_12] : memref<1x1x128xf32, #tpu.memory_space<vmem>>, vector<1x1x128xf32>
    tpu.vector_store %arg6[%c0_10, %c0_11, %c0_12], %16 {strides = array<i32>} : memref<1x1x128xf32, #tpu.memory_space<vmem>>, vector<1x1x128xf32>,
    return
  }
  func.func @transform_0(%arg0: i32) -> (i32, i32) {
    %c0_i32 = arith.constant 0 : i32
    %c0_i32_0 = arith.constant 0 : i32
    return %arg0, %c0_i32 : i32, i32
  }
  func.func @transform_1(%arg0: i32) -> (i32, i32) {
    %c0_i32 = arith.constant 0 : i32
    %c0_i32_0 = arith.constant 0 : i32
    %c0_i32_1 = arith.constant 0 : i32
    return %c0_i32, %c0_i32_0 : i32, i32
  }
  func.func @transform_2(%arg0: i32) -> (i32, i32) {
    %c0_i32 = arith.constant 0 : i32
    %c0_i32_0 = arith.constant 0 : i32
    %c0_i32_1 = arith.constant 0 : i32
    return %c0_i32, %c0_i32_0 : i32, i32
  }
  func.func @transform_3(%arg0: i32) -> (i32, i32) {
    %c0_i32 = arith.constant 0 : i32
    %c0_i32_0 = arith.constant 0 : i32
    %c0_i32_1 = arith.constant 0 : i32
    return %c0_i32, %c0_i32_0 : i32, i32
  }
  func.func @transform_4(%arg0: i32) -> i32 {
    %c0_i32 = arith.constant 0 : i32
    %c0_i32_0 = arith.constant 0 : i32
    return %c0_i32 : i32
  }
  func.func @transform_5(%arg0: i32) -> (i32, i32, i32) {
    %c0_i32 = arith.constant 0 : i32
    %c0_i32_0 = arith.constant 0 : i32
    %c0_i32_1 = arith.constant 0 : i32
    return %arg0, %c0_i32, %c0_i32_0 : i32, i32, i32
  }
}

</mosaic_0001>

<bundles_post_ra>
// kernel: net_forward.1
= control target key start
LH: loop header
LB: loop body
LE: loop exit
PB: predicated region body
PF: predicated region fallthrough
CT: control target
= control target key end

     0   :  { %vm65_vm0 = vcmask 64512   ;;  %v373_v2 = vmov 0   ;;  %s562_s0 = inlined_call_operand.vmem [shape: f32[128,8], index: 0, kind: input, shape index: {}]   ;;  %s563_s1 = inlined_call_operand.vmem [shape: f32[32,8], index: 1, kind: input, shape index: {}]   ;;  %s564_s2 = inlined_call_operand.vmem [shape: f32[32,1], index: 2, kind: input, shape index: {}]   ;;  %s565_s3 = inlined_call_operand.vmem [shape: f32[32,1], index: 3, kind: input, shape index: {}]   ;;  %s566_s4 = inlined_call_operand.<no memory space> [shape: f32[1], index: 4, kind: input, shape index: {}]   ;;  %s567_s5 = inlined_call_operand.vmem [shape: f32[1,1,128], index: 5, kind: output, shape index: {}]  }
   0x1   :  { %v36_v0 = vld [vmem:[%s562_s0 + $0x78] sm:$0xff]  ;;  %v35_v1 = vld [vmem:[%s562_s0 + $0x70] sm:$0xff]  ;;  %371 = vset.pattern.permute.xlu0 %v373_v2  ;;  %372 = vset.pattern.permute.xlu1 %v373_v2  ;;  %v34_v3 = vld [vmem:[%s562_s0 + $0x68] sm:$0xff]  ;;  %v253_v61 = vstv %s566_s4 }
   0x2   :  { %300 = vmatprep.subr.msk.mxu0 %vm65_vm0, %v36_v0  ;;  %338 = vmatprep.subr.msk.mxu1 %vm65_vm0, %v36_v0  ;;  %v37_v4 = vld [vmem:[%s563_s1] sm:$0xff]  ;;  %v39_v5 = vld [vmem:[%s563_s1 + $0x10] sm:$0xff]  ;;  %v42_v9 = vld [vmem:[%s564_s2 + $0x8] sm:$0xff] }
   0x3   :  { %301 = vmatpush3.xpose.msk.msra.mxu0 %vm65_vm0, %v36_v0  ;;  %354 = vmatpush3.xpose.msk.msra.mxu1 %vm65_vm0, %v36_v0  ;;  %v41_v6 = vld [vmem:[%s564_s2] sm:$0xff]  ;;  %v43_v7 = vld [vmem:[%s564_s2 + $0x10] sm:$0xff]  ;;  %v44_v10 = vld [vmem:[%s564_s2 + $0x18] sm:$0xff] }
   0x4   :  { %302 = vmatprep.subr.msk.mxu0 %vm65_vm0, %v35_v1  ;;  %339 = vmatprep.subr.msk.mxu1 %vm65_vm0, %v35_v1  ;;  %v33_v8 = vld [vmem:[%s562_s0 + $0x60] sm:$0xff]  ;;  %v32_v11 = vld [vmem:[%s562_s0 + $0x58] sm:$0xff]  ;;  %v216_v13 = vld [vmem:[%s565_s3 + $0x8] sm:$0xff] }
   0x5   :  { %332 = vmatprep.mubr.msk.f32.mxu0 %vm65_vm0, %v37_v4  ;;  %335 = vmatprep.mubr.msk.f32.mxu1 %vm65_vm0, %v39_v5  ;;  %v215_v12 = vld [vmem:[%s565_s3] sm:$0xff]  ;;  %v31_v14 = vld [vmem:[%s562_s0 + $0x50] sm:$0xff]  ;;  %v218_v16 = vld [vmem:[%s565_s3 + $0x18] sm:$0xff] }
   0x6   :  { %47 = vperm.xlu0 %371, %v41_v6   ;;  %57 = vperm.xlu1 %372, %v43_v7   ;;  %v217_v15 = vld [vmem:[%s565_s3 + $0x10] sm:$0xff]  ;;  %v30_v17 = vld [vmem:[%s562_s0 + $0x48] sm:$0xff]  ;;  %v29_v18 = vld [vmem:[%s562_s0 + $0x40] sm:$0xff] }
   0x7   :  { %303 = vmatpush3.xpose.msk.msra.mxu0 %vm65_vm0, %v35_v1  ;;  %355 = vmatpush3.xpose.msk.msra.mxu1 %vm65_vm0, %v35_v1  ;;  %v28_v19 = vld [vmem:[%s562_s0 + $0x38] sm:$0xff]  ;;  %v27_v20 = vld [vmem:[%s562_s0 + $0x30] sm:$0xff]  ;;  %v26_v21 = vld [vmem:[%s562_s0 + $0x28] sm:$0xff] }
   0x8   :  { %304 = vmatprep.subr.msk.mxu0 %vm65_vm0, %v34_v3  ;;  %340 = vmatprep.subr.msk.mxu1 %vm65_vm0, %v34_v3  ;;  %v25_v22 = vld [vmem:[%s562_s0 + $0x20] sm:$0xff]  ;;  %v24_v23 = vld [vmem:[%s562_s0 + $0x18] sm:$0xff]  ;;  %v23_v24 = vld [vmem:[%s562_s0 + $0x10] sm:$0xff] }
   0x9   :  { %v22_v25 = vld [vmem:[%s562_s0 + $0x8] sm:$0xff]  ;;  %v21_v26 = vld [vmem:[%s562_s0] sm:$0xff]  ;;  %v40_v28 = vld [vmem:[%s563_s1 + $0x18] sm:$0xff] }
   0xa   :  { %52 = vperm.xlu0 %371, %v42_v9   ;;  %62 = vperm.xlu1 %372, %v44_v10   ;;  %v38_v27 = vld [vmem:[%s563_s1 + $0x8] sm:$0xff] }
   0xb   :  { %305 = vmatpush3.xpose.msk.msra.mxu0 %vm65_vm0, %v34_v3  ;;  %356 = vmatpush3.xpose.msk.msra.mxu1 %vm65_vm0, %v34_v3 }
   0xc   :  { %306 = vmatprep.subr.msk.mxu0 %vm65_vm0, %v33_v8  ;;  %341 = vmatprep.subr.msk.mxu1 %vm65_vm0, %v33_v8 }
   0xe   :  { %221 = vperm.xlu0 %371, %v215_v12   ;;  %226 = vperm.xlu1 %372, %v216_v13  }
   0xf   :  { %307 = vmatpush3.xpose.msk.msra.mxu0 %vm65_vm0, %v33_v8  ;;  %357 = vmatpush3.xpose.msk.msra.mxu1 %vm65_vm0, %v33_v8 }
  0x10   :  { %308 = vmatprep.subr.msk.mxu0 %vm65_vm0, %v32_v11  ;;  %342 = vmatprep.subr.msk.mxu1 %vm65_vm0, %v32_v11 }
  0x12   :  { %231 = vperm.xlu0 %371, %v217_v15   ;;  %236 = vperm.xlu1 %372, %v218_v16  }
  0x13   :  { %309 = vmatpush3.xpose.msk.msra.mxu0 %vm65_vm0, %v32_v11  ;;  %358 = vmatpush3.xpose.msk.msra.mxu1 %vm65_vm0, %v32_v11 }
  0x14   :  { %310 = vmatprep.subr.msk.mxu0 %vm65_vm0, %v31_v14  ;;  %343 = vmatprep.subr.msk.mxu1 %vm65_vm0, %v31_v14 }
  0x17   :  { %311 = vmatpush3.xpose.msk.msra.mxu0 %vm65_vm0, %v31_v14  ;;  %359 = vmatpush3.xpose.msk.msra.mxu1 %vm65_vm0, %v31_v14 }
  0x18   :  { %312 = vmatprep.subr.msk.mxu0 %vm65_vm0, %v30_v17  ;;  %344 = vmatprep.subr.msk.mxu1 %vm65_vm0, %v30_v17 }
  0x1b   :  { %313 = vmatpush3.xpose.msk.msra.mxu0 %vm65_vm0, %v30_v17  ;;  %360 = vmatpush3.xpose.msk.msra.mxu1 %vm65_vm0, %v30_v17 }
  0x1c   :  { %314 = vmatprep.subr.msk.mxu0 %vm65_vm0, %v29_v18  ;;  %345 = vmatprep.subr.msk.mxu1 %vm65_vm0, %v29_v18 }
  0x1f   :  { %315 = vmatpush3.xpose.msk.msra.mxu0 %vm65_vm0, %v29_v18  ;;  %361 = vmatpush3.xpose.msk.msra.mxu1 %vm65_vm0, %v29_v18 }
  0x20   :  { %316 = vmatprep.subr.msk.mxu0 %vm65_vm0, %v28_v19  ;;  %346 = vmatprep.subr.msk.mxu1 %vm65_vm0, %v28_v19 }
  0x23   :  { %317 = vmatpush3.xpose.msk.msra.mxu0 %vm65_vm0, %v28_v19  ;;  %362 = vmatpush3.xpose.msk.msra.mxu1 %vm65_vm0, %v28_v19 }
  0x24   :  { %318 = vmatprep.subr.msk.mxu0 %vm65_vm0, %v27_v20  ;;  %347 = vmatprep.subr.msk.mxu1 %vm65_vm0, %v27_v20 }
  0x27   :  { %319 = vmatpush3.xpose.msk.msra.mxu0 %vm65_vm0, %v27_v20  ;;  %363 = vmatpush3.xpose.msk.msra.mxu1 %vm65_vm0, %v27_v20 }
  0x28   :  { %320 = vmatprep.subr.msk.mxu0 %vm65_vm0, %v26_v21  ;;  %348 = vmatprep.subr.msk.mxu1 %vm65_vm0, %v26_v21 }
  0x2b   :  { %321 = vmatpush3.xpose.msk.msra.mxu0 %vm65_vm0, %v26_v21  ;;  %364 = vmatpush3.xpose.msk.msra.mxu1 %vm65_vm0, %v26_v21 }
  0x2c   :  { %322 = vmatprep.subr.msk.mxu0 %vm65_vm0, %v25_v22  ;;  %349 = vmatprep.subr.msk.mxu1 %vm65_vm0, %v25_v22 }
  0x2f   :  { %323 = vmatpush3.xpose.msk.msra.mxu0 %vm65_vm0, %v25_v22  ;;  %365 = vmatpush3.xpose.msk.msra.mxu1 %vm65_vm0, %v25_v22 }
  0x30   :  { %324 = vmatprep.subr.msk.mxu0 %vm65_vm0, %v24_v23  ;;  %350 = vmatprep.subr.msk.mxu1 %vm65_vm0, %v24_v23 }
  0x33   :  { %325 = vmatpush3.xpose.msk.msra.mxu0 %vm65_vm0, %v24_v23  ;;  %366 = vmatpush3.xpose.msk.msra.mxu1 %vm65_vm0, %v24_v23 }
  0x34   :  { %326 = vmatprep.subr.msk.mxu0 %vm65_vm0, %v23_v24  ;;  %351 = vmatprep.subr.msk.mxu1 %vm65_vm0, %v23_v24 }
  0x37   :  { %327 = vmatpush3.xpose.msk.msra.mxu0 %vm65_vm0, %v23_v24  ;;  %367 = vmatpush3.xpose.msk.msra.mxu1 %vm65_vm0, %v23_v24 }
  0x38   :  { %328 = vmatprep.subr.msk.mxu0 %vm65_vm0, %v22_v25  ;;  %352 = vmatprep.subr.msk.mxu1 %vm65_vm0, %v22_v25 }
  0x3b   :  { %329 = vmatpush3.xpose.msk.msra.mxu0 %vm65_vm0, %v22_v25  ;;  %368 = vmatpush3.xpose.msk.msra.mxu1 %vm65_vm0, %v22_v25 }
  0x3c   :  { %330 = vmatprep.subr.msk.mxu0 %vm65_vm0, %v21_v26  ;;  %353 = vmatprep.subr.msk.mxu1 %vm65_vm0, %v21_v26 }
  0x3f   :  { %331 = vmatpush3.xpose.msk.msra.mxu0 %vm65_vm0, %v21_v26  ;;  %369 = vmatpush3.xpose.msk.msra.mxu1 %vm65_vm0, %v21_v26 }
  0x42   :  { %333 = vmatmul.mubr.msk.f32.vlgmr.msra.gmra.mxu0 %vm65_vm0, %v38_v27  ;;  %336 = vmatmul.mubr.msk.f32.vlgmr.msra.gmra.mxu1 %vm65_vm0, %v40_v28 }
  0x81   :  { %v48_v29 = vpop.permute.xlu0 %47  ;;  %v58_v30 = vpop.permute.xlu1 %57 }
  0x85   :  { %v53_v31 = vpop.permute.xlu0 %52  ;;  %v63_v32 = vpop.permute.xlu1 %62 }
  0x89   :  { %v222_v35 = vpop.permute.xlu0 %221  ;;  %v227_v43 = vpop.permute.xlu1 %226 }
  0x8d   :  { %v232_v49 = vpop.permute.xlu0 %231  ;;  %v237_v52 = vpop.permute.xlu1 %236 }
 0x102   :  { %v334_v33 = vpop.f32.mrf.mxu0  ;;  %v337_v34 = vpop.f32.mrf.mxu1 }
 0x103   :  { %v198_v36 = vadd.f32 %v334_v33, %v53_v31  ;;  %v208_v40 = vadd.f32 %v337_v34, %v63_v32 }
 0x104   :  { %v192_v37 = vpop.f32.mrf.mxu0  ;;  %v202_v38 = vpop.f32.mrf.mxu1 }
 0x105   :  { %v212_v39 = vmax.f32 %v198_v36, 0.0  ;;  %v193_v41 = vadd.f32 %v192_v37, %v48_v29  ;;  %v203_v42 = vadd.f32 %v202_v38, %v58_v30  ;;  %v214_v47 = vmax.f32 %v208_v40, 0.0 }
 0x107   :  { %v211_v44 = vmax.f32 %v193_v41, 0.0  ;;  %v213_v45 = vmax.f32 %v203_v42, 0.0  ;;  %v240_v46 = vmul.f32 %v227_v43, %v212_v39  ;;  %v242_v53 = vmul.f32 %v237_v52, %v214_v47 }
 0x109   :  { %v239_v48 = vmul.f32 %v222_v35, %v211_v44  ;;  %v241_v51 = vmul.f32 %v232_v49, %v213_v45 }
 0x10b   :  { %v243_v50 = vadd.f32 %v240_v46, %v239_v48 }
 0x10d   :  { %v244_v54 = vadd.f32 %v243_v50, %v241_v51 }
 0x10f   :  { %v245_v55 = vadd.f32 %v244_v54, %v242_v53 }
 0x111   :  { %v246_v56 = vrot.slane %v245_v55, 4 }
 0x113   :  { %v247_v57 = vadd.f32 %v246_v56, %v245_v55 }
 0x115   :  { %v248_v58 = vrot.slane %v247_v57, 2 }
 0x117   :  { %v249_v59 = vadd.f32 %v248_v58, %v247_v57 }
 0x119   :  { %v250_v60 = vrot.slane %v249_v59, 1 }
 0x11b   :  { %v251_v62 = vadd.f32 %v250_v60, %v249_v59 }
 0x11d   :  { %v254_v63 = vadd.f32 %v253_v61, %v251_v62 }
 0x11f   :  { %255 = vst [vmem:[%s567_s5] sm:$0x1] %v254_v63 }

</bundles_post_ra>
